<compile_context>
chip_gen: v6e
topology: v6e:2x2x1
jax: 0.10.0
libtpu: 0.0.40
codegen_flags: <defaults>
</compile_context>

<pallas_src>
import functools
import math

import jax
import jax.numpy as jnp
from jax.experimental import pallas as pl
from jax.experimental.pallas import tpu as pltpu


# ------------------------------------------------------------ RNN layer kernel
def _rnn_layer_kernel(*refs, use_tanh, fuse_head):
    """One grid step = (direction d, time block t) of one RNN layer.

    Grid is (dirs, nT): direction axis "parallel", time axis "arbitrary".
    The hidden state lives in a persistent VMEM scratch (zeroed at the start of
    each direction's sweep) and is carried as a local value across the
    statically unrolled in-block time loop."""
    if fuse_head:
        (x_ref, wih_ref, whh_ref, b_ref, wfc_ref, out_ref, h_scr, xw_scr) = refs
    else:
        (x_ref, wih_ref, whh_ref, b_ref, out_ref, h_scr, xw_scr) = refs
        wfc_ref = None
    P, bt, B, dpart = x_ref.shape
    H = h_scr.shape[1]

    d = pl.program_id(0)              # direction: 0 = forward, 1 = backward

    @pl.when(pl.program_id(1) == 0)   # fresh hidden state per direction sweep
    def _init():
        h_scr[...] = jnp.zeros_like(h_scr)

    # Hoisted input projection for the whole time block: one MXU matmul per
    # input part.  The previous layer's directions arrive as separate parts, so
    # the W_ih matmul is split instead of concatenating features anywhere.
    # Bias (b_ih + b_hh, pre-summed) is folded in here.
    wih = wih_ref[d]                                          # (Din, H)
    xw = b_ref[d]                                             # (1, H), broadcasts
    for p in range(P):
        xp = x_ref[p].reshape(bt * B, dpart)                  # layout no-op (B=8k)
        xw = xw + jnp.dot(xp, wih[p * dpart:(p + 1) * dpart, :],
                          preferred_element_type=jnp.float32)
    xw_scr[...] = xw.reshape(bt, B, H)

    whh = whh_ref[d]                                          # (H, H)
    h = h_scr[...]                                            # local carry
    for s in range(bt):                                       # static unroll
        tt = s + d * (bt - 1 - 2 * s)                         # s fwd / bt-1-s bwd
        pre = xw_scr[tt] + jnp.dot(h, whh,
                                   preferred_element_type=jnp.float32)
        h = jnp.tanh(pre) if use_tanh else jnp.maximum(pre, 0.0)
        # Reuse the consumed xw slot to hold this step's hidden state; read
        # back once below for a single dense output store (no per-step masked
        # partial stores, no extra hidden-block scratch).
        xw_scr[tt] = h
    h_scr[...] = h                                            # single write-back

    if fuse_head:
        # Fused fc head: VPU mul + lane reduce over the block, dense (bt, B)
        # store — no (bt*B, 1) lane-1 outputs anywhere.
        wfc = wfc_ref[d]                                      # (1, H)
        out_ref[...] = jnp.sum(xw_scr[...] * wfc,
                               axis=-1)[None, None].astype(out_ref.dtype)
    else:
        out_ref[...] = xw_scr[...][None].astype(out_ref.dtype)


def _rnn_layer(x, wih, whh, bias, *, bt, use_tanh, wfc=None, vmem_limit_bytes):
    """One RNN layer (both directions in one pallas_call).

    x: (P, T, B, dpart) time-major, P = #input parts (1 for layer 0, dirs after).
    Returns (dirs, T, B, H) hidden states, or (dirs, nT, bt, B) fused fc-logit
    contributions when wfc is given (last layer)."""
    P, T, B, dpart = x.shape
    dirs, din, H = wih.shape
    nT = T // bt
    fuse = wfc is not None

    def tb(d, t):                     # time-block index per direction
        return t + d * (nT - 1 - 2 * t)

    in_specs = [
        pl.BlockSpec((P, bt, B, dpart), lambda d, t: (0, tb(d, t), 0, 0)),
        # Weight blocks are grid-invariant -> fetched once, kernel indexes [d].
        pl.BlockSpec((dirs, din, H), lambda d, t: (0, 0, 0)),
        pl.BlockSpec((dirs, H, H), lambda d, t: (0, 0, 0)),
        pl.BlockSpec((dirs, 1, H), lambda d, t: (0, 0, 0)),
    ]
    args = [x, wih, whh, bias]
    if fuse:
        in_specs.append(pl.BlockSpec((dirs, 1, H), lambda d, t: (0, 0, 0)))
        args.append(wfc)
        out_shape = jax.ShapeDtypeStruct((dirs, nT, bt, B), jnp.float32)
        out_specs = pl.BlockSpec((1, 1, bt, B), lambda d, t: (d, tb(d, t), 0, 0))
    else:
        out_shape = jax.ShapeDtypeStruct((dirs, T, B, H), jnp.float32)
        out_specs = pl.BlockSpec((1, bt, B, H), lambda d, t: (d, tb(d, t), 0, 0))

    kernel = functools.partial(_rnn_layer_kernel, use_tanh=use_tanh,
                               fuse_head=fuse)
    return pl.pallas_call(
        kernel,
        out_shape=out_shape,
        grid=(dirs, nT),
        in_specs=in_specs,
        out_specs=out_specs,
        scratch_shapes=[pltpu.VMEM((B, H), jnp.float32),       # hidden state
                        pltpu.VMEM((bt, B, H), jnp.float32)],  # xw / h block
        compiler_params=pltpu.CompilerParams(
            # Direction axis can be split across TensorCores (v7x megacore);
            # the time axis is the sequential recurrence.
            dimension_semantics=("parallel", "arbitrary"),
            vmem_limit_bytes=vmem_limit_bytes),
    )(*args)


# ------------------------------------------------------------- sizing helpers
def _vmem_limit_bytes():
    """Generation-dependent VMEM budget (don't impose the v7x cap on v5e/v6e)."""
    try:
        cap = int(pltpu.get_tpu_info().vmem_capacity_bytes)
    except Exception:                                   # conservative fallback
        return 32 * 1024 * 1024
    return int(min(max(cap - 16 * 1024 * 1024, 32 * 1024 * 1024),
                   100 * 1024 * 1024))


def _pick_block_t(T, B, din, H, vmem_budget, block_t=None):
    """Largest time block that divides T, fits a simple VMEM model and keeps the
    static unroll short enough for vreg pressure / compile time."""
    if block_t is None:
        def block_bytes(bt):
            return 4 * (2 * bt * B * din            # x block (double buffered)
                        + 2 * bt * B * H            # out block (double buffered)
                        + bt * B * H                # xw scratch
                        + B * H                     # hidden state
                        + 2 * 2 * (din * H + H * H + 2 * H))   # stacked weights
        bt = T
        while bt > 1 and block_bytes(bt) > vmem_budget:
            bt -= 1
        # TODO(synk): above this cap switch the in-block loop to
        # lax.fori_loop(..., unroll=8) instead of a full static unroll.
        block_t = min(bt, 32)
    target = max(1, min(int(block_t), T))
    for bt in range(target, 0, -1):
        if T % bt == 0:
            return bt
    return 1


# --------------------------------------------------------------- full forward
def binary_classification_rnn_forward(x, params, *, hidden_size, num_layers,
                                       bidirectional, use_tanh, block_t=None):
    """x: (B, T, input_size) batch-first; returns (B, T, 1) sigmoid probs."""
    B, T, in_size = x.shape
    dirs = 2 if bidirectional else 1
    H = hidden_size
    vmem_limit = _vmem_limit_bytes()
    # Pad batch to a sublane multiple so every in-kernel (B, H) tile is dense.
    B_pad = max(8, ((B + 7) // 8) * 8)
    bt = _pick_block_t(T, B_pad, max(in_size, dirs * H), H, vmem_limit, block_t)

    # Batch-first -> time-major once (layer 0 only); keep f32 between layers to
    # match the PyTorch module's numerics.
    # TODO(synk): layer 0 could read the batch-first array directly (3-D
    # BlockSpec) to avoid this single HBM transpose pass (v5e micro-opt).
    xt = jnp.transpose(x.astype(jnp.float32), (1, 0, 2))        # (T, B, Din)
    if B_pad != B:
        xt = jnp.pad(xt, ((0, 0), (0, B_pad - B), (0, 0)))
    h_in = xt[None]                                             # (1, T, B_pad, Din)

    logits = None
    for layer in range(num_layers):
        last = layer == num_layers - 1
        wih = jnp.stack([params["rnn"][(layer, d)][0] for d in range(dirs)])
        whh = jnp.stack([params["rnn"][(layer, d)][1] for d in range(dirs)])
        bias = jnp.stack([params["rnn"][(layer, d)][2] for d in range(dirs)])
        wfc = None
        if last:
            wfc = jnp.stack([params["fc_w"][d * H:(d + 1) * H, :].T
                             for d in range(dirs)])             # (dirs, 1, H)
        out = _rnn_layer(h_in, wih, whh, bias, bt=bt, use_tanh=use_tanh,
                         wfc=wfc, vmem_limit_bytes=vmem_limit)
        if last:
            logits = out                                        # (dirs, nT, bt, B_pad)
        else:
            h_in = out                                          # (dirs, T, B_pad, H)
        # TODO(synk): inter-layer rnn_dropout is training-only in PyTorch; this
        # implements inference (dropout = identity).

    # Head combine (direction sum + fc bias + sigmoid) in plain JAX: a few-KB
    # elementwise op; replaces the former lane-1 head_combine pallas_call.
    logit = logits.sum(axis=0).reshape(T, B_pad) + params["fc_b"][0, 0]
    probs = jax.nn.sigmoid(logit)                               # (T, B_pad)
    return jnp.transpose(probs)[:B, :, None].astype(x.dtype)    # (B, T, 1)


# -------------------------------------------------------------- param builder
def init_params(key, *, input_size, hidden_size, num_layers, bidirectional):
    dirs = 2 if bidirectional else 1
    k = 1.0 / math.sqrt(hidden_size)
    params = {"rnn": {}}
    for layer in range(num_layers):
        din = input_size if layer == 0 else hidden_size * dirs
        for d in range(dirs):
            key, k1, k2, k3, k4 = jax.random.split(key, 5)
            # stored already transposed for x @ W_ih and h @ W_hh
            w_ih = jax.random.uniform(k1, (din, hidden_size), jnp.float32, -k, k)
            w_hh = jax.random.uniform(k2, (hidden_size, hidden_size),
                                      jnp.float32, -k, k)
            b_ih = jax.random.uniform(k3, (1, hidden_size), jnp.float32, -k, k)
            b_hh = jax.random.uniform(k4, (1, hidden_size), jnp.float32, -k, k)
            # biases pre-summed: one VPU add removed from every timestep
            params["rnn"][(layer, d)] = (w_ih, w_hh, b_ih + b_hh)
    fc_in = hidden_size * dirs
    kf = 1.0 / math.sqrt(fc_in)
    key, k1, k2 = jax.random.split(key, 3)
    params["fc_w"] = jax.random.uniform(k1, (fc_in, 1), jnp.float32, -kf, kf)
    params["fc_b"] = jax.random.uniform(k2, (1, 1), jnp.float32, -kf, kf)
    return params


# --------------------------------------------------------- pure-JAX reference
def _reference_forward(x, params, *, hidden_size, num_layers, bidirectional,
                       use_tanh):
    B, T, _ = x.shape
    dirs = 2 if bidirectional else 1
    h_in = x.astype(jnp.float32)
    for layer in range(num_layers):
        outs = []
        for d in range(dirs):
            w_ih, w_hh, bias = params["rnn"][(layer, d)]
            seq = h_in if d == 0 else h_in[:, ::-1, :]
            h = jnp.zeros((B, hidden_size), jnp.float32)
            ys = []
            for t in range(T):
                pre = seq[:, t, :] @ w_ih + h @ w_hh + bias
                h = jnp.tanh(pre) if use_tanh else jnp.maximum(pre, 0.0)
                ys.append(h)
            y = jnp.stack(ys, axis=1)
            if d == 1:
                y = y[:, ::-1, :]
            outs.append(y)
        h_in = jnp.concatenate(outs, axis=-1) if dirs == 2 else outs[0]
    logits = h_in @ params["fc_w"] + params["fc_b"]
    return 1.0 / (1.0 + jnp.exp(-logits))


if __name__ == "__main__":
    # Small config consistent with the module:
    input_size = 16
    hidden_size = 32
    bidirectional = True
    num_rnn_layers = 2
    rnn_dropout = 0.0          # inference: no dropout applied
    use_tanh_instead_of_relu = False

    batch, seq = 2, 8

    key = jax.random.PRNGKey(0)
    key, xk = jax.random.split(key)
    x = jax.random.normal(xk, (batch, seq, input_size), dtype=jnp.float32)

    params = init_params(key,
                         input_size=input_size,
                         hidden_size=hidden_size,
                         num_layers=num_rnn_layers,
                         bidirectional=bidirectional)

    out = binary_classification_rnn_forward(
        x, params,
        hidden_size=hidden_size,
        num_layers=num_rnn_layers,
        bidirectional=bidirectional,
        use_tanh=use_tanh_instead_of_relu,
        block_t=4)                       # T=8 -> 2 time blocks (exercise grid)
    out = jax.block_until_ready(out)

    assert out.shape == (batch, seq, 1)
    assert bool(jnp.all((out >= 0.0) & (out <= 1.0)))

    ref = _reference_forward(x, params,
                             hidden_size=hidden_size,
                             num_layers=num_rnn_layers,
                             bidirectional=bidirectional,
                             use_tanh=use_tanh_instead_of_relu)
    assert bool(jnp.allclose(out, ref, atol=1e-3, rtol=1e-3)), (
        "mismatch vs reference: max abs diff "
        f"{float(jnp.max(jnp.abs(out - ref)))}")

    print("KERNEL_OK")
</pallas_src>

<mosaic_0001>
module attributes {stable_mosaic.version = 11 : i64} {
  func.func @_rnn_layer_kernel(%arg0: i32, %arg1: i32, %arg2: memref<1x4x8x16xf32, #tpu.memory_space<vmem>>, %arg3: memref<2x16x32xf32, #tpu.memory_space<vmem>>, %arg4: memref<2x32x32xf32, #tpu.memory_space<vmem>>, %arg5: memref<2x1x32xf32, #tpu.memory_space<vmem>>, %arg6: memref<1x4x8x32xf32, #tpu.memory_space<vmem>>, %arg7: memref<8x32xf32, #tpu.memory_space<vmem>>, %arg8: memref<4x8x32xf32, #tpu.memory_space<vmem>>) attributes {dimension_semantics = [#tpu.dimension_semantics<parallel>, #tpu.dimension_semantics<arbitrary>], iteration_bounds = array<i64: 2, 2>, scalar_prefetch = 0 : i64, scratch_operands = 2 : i64, tpu.core_type = #tpu.core_type<tc>, window_params = [{transform_indices = @transform_0, window_bounds = array<i64: 1, 4, 8, 16>}, {pipeline_mode = #tpu.pipeline_mode<synchronous>, transform_indices = @transform_1, window_bounds = array<i64: 2, 16, 32>}, {pipeline_mode = #tpu.pipeline_mode<synchronous>, transform_indices = @transform_2, window_bounds = array<i64: 2, 32, 32>}, {pipeline_mode = #tpu.pipeline_mode<synchronous>, transform_indices = @transform_3, window_bounds = array<i64: 2, 1, 32>}, {transform_indices = @transform_4, window_bounds = array<i64: 1, 4, 8, 32>}]} {
    %c0_i32 = arith.constant 0 : i32
    %0 = arith.cmpi eq, %arg1, %c0_i32 : i32
    %1 = arith.extui %0 : i1 to i32
    %c0_i32_0 = arith.constant 0 : i32
    %2 = arith.cmpi ne, %1, %c0_i32_0 : i32
    scf.if %2 {
      %cst_51 = arith.constant 0.000000e+00 : f32
      %77 = vector.broadcast %cst_51 : f32 to vector<8x32xf32>
      %c0_52 = arith.constant 0 : index
      %c0_53 = arith.constant 0 : index
      %78 = vector.load %arg7[%c0_52, %c0_53] : memref<8x32xf32, #tpu.memory_space<vmem>>, vector<8x32xf32>
      tpu.vector_store %arg7[%c0_52, %c0_53], %77 {strides = array<i32>} : memref<8x32xf32, #tpu.memory_space<vmem>>, vector<8x32xf32>,
    } else {
    }
    %3 = arith.index_cast %arg0 : i32 to index
    %c0 = arith.constant 0 : index
    %c0_1 = arith.constant 0 : index
    %4 = vector.load %arg3[%3, %c0, %c0_1] : memref<2x16x32xf32, #tpu.memory_space<vmem>>, vector<1x16x32xf32>
    %5 = vector.shape_cast %4 : vector<1x16x32xf32> to vector<16x32xf32>
    %6 = arith.index_cast %arg0 : i32 to index
    %c0_2 = arith.constant 0 : index
    %c0_3 = arith.constant 0 : index
    %7 = vector.load %arg5[%6, %c0_2, %c0_3] : memref<2x1x32xf32, #tpu.memory_space<vmem>>, vector<1x1x32xf32>
    %8 = vector.shape_cast %7 : vector<1x1x32xf32> to vector<1x32xf32>
    %c0_4 = arith.constant 0 : index
    %c0_5 = arith.constant 0 : index
    %c0_6 = arith.constant 0 : index
    %c0_7 = arith.constant 0 : index
    %9 = vector.load %arg2[%c0_4, %c0_5, %c0_6, %c0_7] : memref<1x4x8x16xf32, #tpu.memory_space<vmem>>, vector<1x4x8x16xf32>
    %10 = vector.shape_cast %9 : vector<1x4x8x16xf32> to vector<4x8x16xf32>
    %11 = vector.shape_cast %10 : vector<4x8x16xf32> to vector<32x16xf32>
    %cst = arith.constant dense<0.000000e+00> : vector<32x32xf32>
    %12 = tpu.matmul %11, %5, %cst {dimension_numbers = #tpu.dot_dimension_numbers<[1], [0], [0], [1], [0, 0, 1, 1], [], []>} : vector<32x16xf32>, vector<16x32xf32>, vector<32x32xf32> -> vector<32x32xf32>
    %13 = vector.broadcast %8 : vector<1x32xf32> to vector<32x32xf32>
    %14 = arith.addf %13, %12 : vector<32x32xf32>
    %15 = vector.shape_cast %14 : vector<32x32xf32> to vector<4x8x32xf32>
    %c0_8 = arith.constant 0 : index
    %c0_9 = arith.constant 0 : index
    %c0_10 = arith.constant 0 : index
    %16 = vector.load %arg8[%c0_8, %c0_9, %c0_10] : memref<4x8x32xf32, #tpu.memory_space<vmem>>, vector<4x8x32xf32>
    tpu.vector_store %arg8[%c0_8, %c0_9, %c0_10], %15 {strides = array<i32>} : memref<4x8x32xf32, #tpu.memory_space<vmem>>, vector<4x8x32xf32>,
    %17 = arith.index_cast %arg0 : i32 to index
    %c0_11 = arith.constant 0 : index
    %c0_12 = arith.constant 0 : index
    %18 = vector.load %arg4[%17, %c0_11, %c0_12] : memref<2x32x32xf32, #tpu.memory_space<vmem>>, vector<1x32x32xf32>
    %19 = vector.shape_cast %18 : vector<1x32x32xf32> to vector<32x32xf32>
    %c0_13 = arith.constant 0 : index
    %c0_14 = arith.constant 0 : index
    %20 = vector.load %arg7[%c0_13, %c0_14] : memref<8x32xf32, #tpu.memory_space<vmem>>, vector<8x32xf32>
    %c3_i32 = arith.constant 3 : i32
    %21 = arith.muli %arg0, %c3_i32 : i32
    %c0_i32_15 = arith.constant 0 : i32
    %22 = arith.addi %c0_i32_15, %21 : i32
    %23 = arith.index_cast %22 : i32 to index
    %c0_16 = arith.constant 0 : index
    %c0_17 = arith.constant 0 : index
    %24 = vector.load %arg8[%23, %c0_16, %c0_17] : memref<4x8x32xf32, #tpu.memory_space<vmem>>, vector<1x8x32xf32>
    %25 = vector.shape_cast %24 : vector<1x8x32xf32> to vector<8x32xf32>
    %cst_18 = arith.constant dense<0.000000e+00> : vector<8x32xf32>
    %26 = tpu.matmul %20, %19, %cst_18 {dimension_numbers = #tpu.dot_dimension_numbers<[1], [0], [0], [1], [0, 0, 1, 1], [], []>} : vector<8x32xf32>, vector<32x32xf32>, vector<8x32xf32> -> vector<8x32xf32>
    %27 = arith.addf %25, %26 : vector<8x32xf32>
    %cst_19 = arith.constant 0.000000e+00 : f32
    %28 = vector.broadcast %cst_19 : f32 to vector<8x32xf32>
    %29 = arith.maximumf %27, %28 : vector<8x32xf32>
    %30 = arith.index_cast %22 : i32 to index
    %c0_20 = arith.constant 0 : index
    %c0_21 = arith.constant 0 : index
    %31 = vector.load %arg8[%30, %c0_20, %c0_21] : memref<4x8x32xf32, #tpu.memory_space<vmem>>, vector<1x8x32xf32>
    %32 = vector.shape_cast %31 : vector<1x8x32xf32> to vector<8x32xf32>
    %33 = vector.shape_cast %29 : vector<8x32xf32> to vector<1x8x32xf32>
    tpu.vector_store %arg8[%30, %c0_20, %c0_21], %33 {strides = array<i32>} : memref<4x8x32xf32, #tpu.memory_space<vmem>>, vector<1x8x32xf32>,
    %c1_i32 = arith.constant 1 : i32
    %34 = arith.muli %arg0, %c1_i32 : i32
    %c1_i32_22 = arith.constant 1 : i32
    %35 = arith.addi %c1_i32_22, %34 : i32
    %36 = arith.index_cast %35 : i32 to index
    %c0_23 = arith.constant 0 : index
    %c0_24 = arith.constant 0 : index
    %37 = vector.load %arg8[%36, %c0_23, %c0_24] : memref<4x8x32xf32, #tpu.memory_space<vmem>>, vector<1x8x32xf32>
    %38 = vector.shape_cast %37 : vector<1x8x32xf32> to vector<8x32xf32>
    %cst_25 = arith.constant dense<0.000000e+00> : vector<8x32xf32>
    %39 = tpu.matmul %29, %19, %cst_25 {dimension_numbers = #tpu.dot_dimension_numbers<[1], [0], [0], [1], [0, 0, 1, 1], [], []>} : vector<8x32xf32>, vector<32x32xf32>, vector<8x32xf32> -> vector<8x32xf32>
    %40 = arith.addf %38, %39 : vector<8x32xf32>
    %cst_26 = arith.constant 0.000000e+00 : f32
    %41 = vector.broadcast %cst_26 : f32 to vector<8x32xf32>
    %42 = arith.maximumf %40, %41 : vector<8x32xf32>
    %43 = arith.index_cast %35 : i32 to index
    %c0_27 = arith.constant 0 : index
    %c0_28 = arith.constant 0 : index
    %44 = vector.load %arg8[%43, %c0_27, %c0_28] : memref<4x8x32xf32, #tpu.memory_space<vmem>>, vector<1x8x32xf32>
    %45 = vector.shape_cast %44 : vector<1x8x32xf32> to vector<8x32xf32>
    %46 = vector.shape_cast %42 : vector<8x32xf32> to vector<1x8x32xf32>
    tpu.vector_store %arg8[%43, %c0_27, %c0_28], %46 {strides = array<i32>} : memref<4x8x32xf32, #tpu.memory_space<vmem>>, vector<1x8x32xf32>,
    %c-1_i32 = arith.constant -1 : i32
    %47 = arith.muli %arg0, %c-1_i32 : i32
    %c2_i32 = arith.constant 2 : i32
    %48 = arith.addi %c2_i32, %47 : i32
    %49 = arith.index_cast %48 : i32 to index
    %c0_29 = arith.constant 0 : index
    %c0_30 = arith.constant 0 : index
    %50 = vector.load %arg8[%49, %c0_29, %c0_30] : memref<4x8x32xf32, #tpu.memory_space<vmem>>, vector<1x8x32xf32>
    %51 = vector.shape_cast %50 : vector<1x8x32xf32> to vector<8x32xf32>
    %cst_31 = arith.constant dense<0.000000e+00> : vector<8x32xf32>
    %52 = tpu.matmul %42, %19, %cst_31 {dimension_numbers = #tpu.dot_dimension_numbers<[1], [0], [0], [1], [0, 0, 1, 1], [], []>} : vector<8x32xf32>, vector<32x32xf32>, vector<8x32xf32> -> vector<8x32xf32>
    %53 = arith.addf %51, %52 : vector<8x32xf32>
    %cst_32 = arith.constant 0.000000e+00 : f32
    %54 = vector.broadcast %cst_32 : f32 to vector<8x32xf32>
    %55 = arith.maximumf %53, %54 : vector<8x32xf32>
    %56 = arith.index_cast %48 : i32 to index
    %c0_33 = arith.constant 0 : index
    %c0_34 = arith.constant 0 : index
    %57 = vector.load %arg8[%56, %c0_33, %c0_34] : memref<4x8x32xf32, #tpu.memory_space<vmem>>, vector<1x8x32xf32>
    %58 = vector.shape_cast %57 : vector<1x8x32xf32> to vector<8x32xf32>
    %59 = vector.shape_cast %55 : vector<8x32xf32> to vector<1x8x32xf32>
    tpu.vector_store %arg8[%56, %c0_33, %c0_34], %59 {strides = array<i32>} : memref<4x8x32xf32, #tpu.memory_space<vmem>>, vector<1x8x32xf32>,
    %c-3_i32 = arith.constant -3 : i32
    %60 = arith.muli %arg0, %c-3_i32 : i32
    %c3_i32_35 = arith.constant 3 : i32
    %61 = arith.addi %c3_i32_35, %60 : i32
    %62 = arith.index_cast %61 : i32 to index
    %c0_36 = arith.constant 0 : index
    %c0_37 = arith.constant 0 : index
    %63 = vector.load %arg8[%62, %c0_36, %c0_37] : memref<4x8x32xf32, #tpu.memory_space<vmem>>, vector<1x8x32xf32>
    %64 = vector.shape_cast %63 : vector<1x8x32xf32> to vector<8x32xf32>
    %cst_38 = arith.constant dense<0.000000e+00> : vector<8x32xf32>
    %65 = tpu.matmul %55, %19, %cst_38 {dimension_numbers = #tpu.dot_dimension_numbers<[1], [0], [0], [1], [0, 0, 1, 1], [], []>} : vector<8x32xf32>, vector<32x32xf32>, vector<8x32xf32> -> vector<8x32xf32>
    %66 = arith.addf %64, %65 : vector<8x32xf32>
    %cst_39 = arith.constant 0.000000e+00 : f32
    %67 = vector.broadcast %cst_39 : f32 to vector<8x32xf32>
    %68 = arith.maximumf %66, %67 : vector<8x32xf32>
    %69 = arith.index_cast %61 : i32 to index
    %c0_40 = arith.constant 0 : index
    %c0_41 = arith.constant 0 : index
    %70 = vector.load %arg8[%69, %c0_40, %c0_41] : memref<4x8x32xf32, #tpu.memory_space<vmem>>, vector<1x8x32xf32>
    %71 = vector.shape_cast %70 : vector<1x8x32xf32> to vector<8x32xf32>
    %72 = vector.shape_cast %68 : vector<8x32xf32> to vector<1x8x32xf32>
    tpu.vector_store %arg8[%69, %c0_40, %c0_41], %72 {strides = array<i32>} : memref<4x8x32xf32, #tpu.memory_space<vmem>>, vector<1x8x32xf32>,
    %c0_42 = arith.constant 0 : index
    %c0_43 = arith.constant 0 : index
    %73 = vector.load %arg7[%c0_42, %c0_43] : memref<8x32xf32, #tpu.memory_space<vmem>>, vector<8x32xf32>
    tpu.vector_store %arg7[%c0_42, %c0_43], %68 {strides = array<i32>} : memref<8x32xf32, #tpu.memory_space<vmem>>, vector<8x32xf32>,
    %c0_44 = arith.constant 0 : index
    %c0_45 = arith.constant 0 : index
    %c0_46 = arith.constant 0 : index
    %74 = vector.load %arg8[%c0_44, %c0_45, %c0_46] : memref<4x8x32xf32, #tpu.memory_space<vmem>>, vector<4x8x32xf32>
    %75 = vector.shape_cast %74 : vector<4x8x32xf32> to vector<1x4x8x32xf32>
    %c0_47 = arith.constant 0 : index
    %c0_48 = arith.constant 0 : index
    %c0_49 = arith.constant 0 : index
    %c0_50 = arith.constant 0 : index
    %76 = vector.load %arg6[%c0_47, %c0_48, %c0_49, %c0_50] : memref<1x4x8x32xf32, #tpu.memory_space<vmem>>, vector<1x4x8x32xf32>
    tpu.vector_store %arg6[%c0_47, %c0_48, %c0_49, %c0_50], %75 {strides = array<i32>} : memref<1x4x8x32xf32, #tpu.memory_space<vmem>>, vector<1x4x8x32xf32>,
    return
  }
  func.func @transform_0(%arg0: i32, %arg1: i32) -> (i32, i32, i32, i32) {
    %c2_i32 = arith.constant 2 : i32
    %0 = arith.muli %c2_i32, %arg1 : i32
    %c1_i32 = arith.constant 1 : i32
    %1 = arith.subi %c1_i32, %0 : i32
    %2 = arith.muli %arg0, %1 : i32
    %3 = arith.addi %arg1, %2 : i32
    %c0_i32 = arith.constant 0 : i32
    %c0_i32_0 = arith.constant 0 : i32
    %c0_i32_1 = arith.constant 0 : i32
    %c0_i32_2 = arith.constant 0 : i32
    return %c0_i32, %3, %c0_i32_0, %c0_i32_1 : i32, i32, i32, i32
  }
  func.func @transform_1(%arg0: i32, %arg1: i32) -> (i32, i32, i32) {
    %c0_i32 = arith.constant 0 : i32
    %c0_i32_0 = arith.constant 0 : i32
    %c0_i32_1 = arith.constant 0 : i32
    %c0_i32_2 = arith.constant 0 : i32
    return %c0_i32, %c0_i32_0, %c0_i32_1 : i32, i32, i32
  }
  func.func @transform_2(%arg0: i32, %arg1: i32) -> (i32, i32, i32) {
    %c0_i32 = arith.constant 0 : i32
    %c0_i32_0 = arith.constant 0 : i32
    %c0_i32_1 = arith.constant 0 : i32
    %c0_i32_2 = arith.constant 0 : i32
    return %c0_i32, %c0_i32_0, %c0_i32_1 : i32, i32, i32
  }
  func.func @transform_3(%arg0: i32, %arg1: i32) -> (i32, i32, i32) {
    %c0_i32 = arith.constant 0 : i32
    %c0_i32_0 = arith.constant 0 : i32
    %c0_i32_1 = arith.constant 0 : i32
    %c0_i32_2 = arith.constant 0 : i32
    return %c0_i32, %c0_i32_0, %c0_i32_1 : i32, i32, i32
  }
  func.func @transform_4(%arg0: i32, %arg1: i32) -> (i32, i32, i32, i32) {
    %c2_i32 = arith.constant 2 : i32
    %0 = arith.muli %c2_i32, %arg1 : i32
    %c1_i32 = arith.constant 1 : i32
    %1 = arith.subi %c1_i32, %0 : i32
    %2 = arith.muli %arg0, %1 : i32
    %3 = arith.addi %arg1, %2 : i32
    %c0_i32 = arith.constant 0 : i32
    %c0_i32_0 = arith.constant 0 : i32
    %c0_i32_1 = arith.constant 0 : i32
    return %arg0, %3, %c0_i32, %c0_i32_0 : i32, i32, i32, i32
  }
}

</mosaic_0001>

<bundles_post_ra>
// kernel: tpu_custom_call.1
= control target key start
LH: loop header
LB: loop body
LE: loop exit
PB: predicated region body
PF: predicated region fallthrough
CT: control target
= control target key end

     0   :  { %s1756_s0 = inlined_call_operand.hbm [shape: f32[1,8,8,16], index: 0, kind: input, shape index: {}]   ;;  %s1757_s1 = inlined_call_operand.hbm [shape: f32[2,16,32], index: 1, kind: input, shape index: {}]   ;;  %s1758_s2 = inlined_call_operand.hbm [shape: f32[2,32,32], index: 2, kind: input, shape index: {}]   ;;  %s1759_s3 = inlined_call_operand.vmem [shape: f32[2,1,32], index: 3, kind: input, shape index: {}]   ;;  %s1760_s4 = inlined_call_operand.hbm [shape: f32[2,8,8,32], index: 4, kind: output, shape index: {}]  }
   0x1   :  { %1774 = sst [smem:[#allocation19_spill]] %s1757_s1 }
   0x2   :  { %1775 = sst [smem:[#allocation20_spill]] %s1758_s2 }
   0x3   :  { %1776 = sst [smem:[#allocation21_spill]] %s1760_s4 }
   0x4   :  { %9 = vsyncpa [#allocation5], 0 }
   0x5   :  { %11 = vsyncpa [#allocation5 + $0x1], 0 }
   0x6   :  { %12 = vsyncpa [#allocation8], 0 }
   0x7   :  { %13 = vsyncpa [#allocation6], 0 }
   0x8   :  { %15 = vsyncpa [#allocation6 + $0x1], 0  ;;  %s1398_s15 = smov 0   ;;  %s1400_s16 = smov 0  }
   0x9   :  { %s1402_s17 = smov 0   ;;  %s1404_s18 = smov 0  }
   0xa   :  { %s1406_s19 = smov 0   ;;  %s1408_s20 = smov 0  }
   0xb   :  { %s1410_s21 = smov 0   ;;  %s1412_s22 = smov 0  }
   0xc   :  { %s1414_s23 = smov 0   ;;  %s1416_s24 = smov 0  }
   0xd   :  { %s1418_s25 = smov 0  }
   0xe LB: > { %1777 = sst [smem:[#allocation14_spill]] %s1320_s15  ;;  %s899_s26 = sadd.s32 4294967295, %s1360_s25   ;;  %s1360_s25 = sphi %s1418_s25, %s21_s25   ;;  %s1356_s24 = sphi %s1416_s24, %s1806_s24   ;;  %s1352_s23 = sphi %s1414_s23, %s1813_s23   ;;  %s1348_s22 = sphi %s1412_s22, %s1805_s22   ;;  %s1344_s21 = sphi %s1410_s21, %s1804_s21   ;;  %s1340_s20 = sphi %s1408_s20, %s1812_s20   ;;  %s1336_s19 = sphi %s1406_s19, %s1811_s19   ;;  %s1332_s18 = sphi %s1404_s18, %s1810_s18   ;;  %s1328_s17 = sphi %s1402_s17, %s1809_s17   ;;  %s1324_s16 = sphi %s1400_s16, %s1808_s16   ;;  %s1320_s15 = sphi %s1398_s15, %s1807_s15  }
   0xf   : > { %1778 = sst [smem:[#allocation15_spill]] %s1352_s23  ;;  %s900_s27 = sadd.s32 4294967294, %s1360_s25  }
  0x10   : > { %1779 = sst [smem:[#allocation16_spill]] %s1356_s24  ;;  %p61_p0 = scmp.ne.s32.totalorder %s1336_s19, %s1332_s18 }
  0x11   : > { %p1454_p1 = scmp.eq.s32.totalorder %s899_s26, 0  ;;  %p157_p2 = scmp.ne.s32.totalorder %s1328_s17, %s1324_s16 }
  0x12   : > { %p158_p3 = scmp.eq.s32.totalorder %s899_s26, 3  ;;  %p163_p5 = scmp.ne.s32.totalorder %s1324_s16, %s1320_s15 }
  0x13   : > { %s1780_s28 = scalar_select %p1454_p1, 1, 0 }
  0x14   : > { %p1462_p4 = por %p1454_p1, %p61_p0  ;;  %p1468_p6 = por %p158_p3, %p157_p2 }
  0x15   : > { %p164_p7 = scmp.eq.s32.totalorder %s900_s27, 3  ;;  %p905_p8 = scmp.ge.s32.totalorder %s1360_s25, 1 }
  0x16   : > { %s1781_s29 = scalar_select %p1462_p4, 1, 0 }
  0x17   : > { %s1782_s30 = scalar_select %p1468_p6, 1, 0 }
  0x18   : > { %p171_p9 = scmp.lt.s32.totalorder %s1360_s25, 5  ;;  %p1474_p10 = por %p164_p7, %p163_p5 }
  0x19   : > { %s1362_s7 = smov [#allocation7]   ;;  %s1363_s10 = smov [#allocation9]  }
  0x1a   : > { %s1783_s5 = scalar_select %p1474_p10, 1, 0 }
  0x1b   : > { %p1478_p11 = pnand %p905_p8, %p171_p9  ;;  %s183_s8 = sshll.u32 %s1362_s7, 4  ;;  %s184_s8 = int_to_ptr.vmem [resolvable:$true] %s183_s8 }
  0x1c   : > { %1784 = sst [smem:[#allocation17_spill]] %s1783_s5  ;;  %s196_s11 = sshll.u32 %s1363_s10, 4  ;;  %s197_s11 = int_to_ptr.vmem [resolvable:$true] %s196_s11 }
  0x1d   : > { %s1785_s6 = scalar_select %p1478_p11, 1, 0 }
  0x1e   : > { %p1038_p12 = pneg %p1478_p11  ;;  %s1167_s12 = scalar_lea.vmem %s184_s8, 512 }
  0x1f   : > { %p1168_p2 = scmp.ne.s32.totalorder %s184_s8, %s1167_s12  ;;  %p1175_p7 = scmp.lt.s32.totalorder %s184_s8, %s184_s8 }
  0x20   : > { %p1486_p13 = pnand %p1038_p12, %p1454_p1  ;;  %p1176_p8 = scmp.lt.s32.totalorder %s1167_s12, %s1167_s12 }
  0x22   : > { %p1158_p0 = pneg %p1486_p13  ;;  %p1177_p9 = por %p1176_p8, %p1175_p7 }
  0x24   : > { %p1170_p3 = pnand %p1168_p2, %p1158_p0 }
  0x26   : > { %p1171_p5 = pneg %p1170_p3 }
  0x28   : > { %p1178_p12 = pnand %p1177_p9, %p1171_p5 }
  0x2a   : > { %1181 = shalt.err (!%p1178_p12)
}
  0x2b   : > { %s1761_s13 = smov 128   ;;  %s1762_s14 = smov 8  }
  0x2c   : > { %s1787_s1 = sld [smem:[#allocation19_spill]]  ;;  %s1193_s27 = scalar_lea.vmem %s197_s11, 1024 }
  0x2d   : > { %p1194_p2 = scmp.ne.s32.totalorder %s197_s11, %s1193_s27  ;;  %p1201_p5 = scmp.lt.s32.totalorder %s197_s11, %s197_s11 }
  0x2e   : > { %p1202_p8 = scmp.lt.s32.totalorder %s1193_s27, %s1193_s27 }
  0x2f   : > { %p1196_p3 = pnand %p1194_p2, %p1158_p0 }
  0x30   : > { %p1203_p9 = por %p1202_p8, %p1201_p5 }
  0x31   : > { %p1197_p7 = pneg %p1196_p3 }
  0x32   : > { %1041 = dma.hbm_to_vmem [thread:$0]  (!%p1486_p13), %s1787_s1, 512, %s184_s8, [#allocation8], %s1761_s13, %s1761_s13, %s1762_s14  }
  0x33   : > { %p1204_p12 = pnand %p1203_p9, %p1197_p7 }
  0x35   : > { %1207 = shalt.err (!%p1204_p12)
}
  0x36   : > { %s1788_s2 = sld [smem:[#allocation20_spill]]  ;;  %s30_s8 = sadd.s32 1, %s1352_s23 }
  0x37   : > { %p31_p0 = scmp.ge.s32.totalorder %s30_s8, 2  ;;  %s33_s9 = sadd.s32 1, %s1356_s24 }
  0x38   : > { %s901_s12 = sshll.u32 %s1352_s23, 1  ;;  %s48_s18 = sadd.s32 1, %s1340_s20 }
  0x39   : > { %s1815_s8 = smov (%p31_p0, %s30_s8), 0  ;;  %s1817_s9 = smov (!%p31_p0, %s33_s9), %s1356_s24 }
  0x3a   : > { %s38_s26 = ssub.s32 1, %s901_s12  ;;  %s902_s27 = sshll.u32 %s1815_s8, 1 }
  0x3b   : > { %p35_p2 = scmp.ge.s32.totalorder %s1817_s9, 2  ;;  %s39_s7 = smul.u32 %s1356_s24, %s38_s26 }
  0x3c   : > { %1044 = dma.hbm_to_vmem [thread:$0]  (!%p1486_p13), %s1788_s2, 1024, %s197_s11, [#allocation8], %s1761_s13, %s1761_s13, %s1762_s14  }
  0x3d   : > { %s42_s11 = ssub.s32 1, %s902_s27  ;;  %p55_p13 = scmp.ne.s32.totalorder %s1340_s20, %s1336_s19 }
  0x3e   : > { %s1819_s9 = smov (%p35_p2, %s1817_s9), 0  ;;  %s40_s10 = sadd.s32 %s1352_s23, %s39_s7 }
  0x3f   : > { %1789 = sst [smem:[#allocation18_spill]] %s1819_s9  ;;  %p56_p3 = scmp.eq.s32.totalorder %s1360_s25, 0 }
  0x40   : > { %s43_s13 = smul.u32 %s42_s11, %s1819_s9  ;;  %s142_s14 = ssub.s32 %s1356_s24, %s1819_s9 }
  0x41   : > { %p1532_p7 = por %p56_p3, %p55_p13  ;;  %s147_s12 = sadd.s32 1, %s1328_s17 }
  0x42   : > { %s44_s26 = sadd.s32 %s43_s13, %s1815_s8  ;;  %p1055_p5 = scmp.lt.s32.totalorder %s1360_s25, 4 }
  0x43   : > { %s45_s27 = ssub.s32 %s40_s10, %s44_s26  ;;  %s213_s2 = sand.u32 1, %s1340_s20  }
  0x44   : > { %p46_p8 = scmp.eq.s32.totalorder %s45_s27, 0  ;;  %s144_s5 = sor.u32 %s142_s14, %s45_s27 }
  0x45   : > { %p145_p9 = scmp.eq.s32.totalorder %s144_s5, 0  ;;  %s909_s11 = sshll.u32 %s213_s2, 5 }
  0x46   : > { %s1541_s15 = scalar_select %p46_p8, %s1340_s20, %s48_s18  }
  0x47   : > { %s1544_s7 = scalar_select %p145_p9, %s1328_s17, %s147_s12  }
  0x48   : > { %s945_s9 = sshll.u32 %s40_s10, 9  ;;  %s217_s13 = scalar_lea.vmem [#allocation4], %s909_s11 }
  0x49   : > { %s1549_s4 = scalar_lea.hbm %s1756_s0, %s945_s9  ;;  %s228_s26 = sshll.u32 %s217_s13, 4  ;;  %s1559_s26 = int_to_ptr.vmem [resolvable:$true] %s228_s26 }
  0x4a   : > { %p1555_p12 = pnand %p1055_p5, %p1532_p7  ;;  %s1561_s14 = scalar_lea.sflag [#allocation5], %s213_s2 }
  0x4b   : > { %s1208_s18 = scalar_lea.hbm %s1549_s4, 512  ;;  %s1213_s1 = scalar_lea.hbm %s1756_s0, 1024 }
  0x4c   : > { %p1209_p0 = scmp.ne.s32.totalorder %s1549_s4, %s1208_s18  ;;  %p1210_p2 = pneg %p1555_p12 }
  0x4d   : > { %p1214_p7 = scmp.lt.s32.totalorder %s1549_s4, %s1756_s0  ;;  %p1215_p5 = scmp.lt.s32.totalorder %s1213_s1, %s1208_s18 }
  0x4e   : > { %p1211_p13 = pnand %p1210_p2, %p1209_p0 }
  0x4f   : > { %p1216_p8 = por %p1215_p5, %p1214_p7 }
  0x50   : > { %p1212_p3 = pneg %p1211_p13 }
  0x52   : > { %p1217_p9 = pnand %p1216_p8, %p1212_p3 }
  0x54   : > { %1220 = shalt.err (!%p1217_p9)
}
  0x55   : > { %s1221_s2 = scalar_lea.vmem %s1559_s26, 512  ;;  %s1366_s12 = smov [#allocation4]  }
  0x56   : > { %p1222_p10 = scmp.ne.s32.totalorder %s1559_s26, %s1221_s2  ;;  %s1226_s27 = sshll.u32 %s1366_s12, 4  ;;  %s1227_s27 = int_to_ptr.vmem [resolvable:$false] %s1226_s27 }
  0x57   : > { %s1228_s11 = scalar_lea.vmem %s1227_s27, 1024  ;;  %p1229_p13 = scmp.lt.s32.totalorder %s1559_s26, %s1227_s27 }
  0x58   : > { %p1224_p6 = pnand %p1222_p10, %p1210_p2  ;;  %p1230_p1 = scmp.lt.s32.totalorder %s1228_s11, %s1221_s2 }
  0x5a   : > { %p1225_p0 = pneg %p1224_p6  ;;  %p1231_p4 = por %p1230_p1, %p1229_p13 }
  0x5c   : > { %p1232_p11 = pnand %p1231_p4, %p1225_p0 }
  0x5e   : > { %1235 = shalt.err (!%p1232_p11)
}
  0x5f   : > { %s1792_s13 = smov 8   ;;  %s1793_s18 = smov 128  }
  0x60   : > { %1048 = dma.hbm_to_vmem [thread:$0]  (!%p1555_p12), %s1549_s4, 512, %s1559_s26, %s1561_s14, %s1793_s18, %s1793_s18, %s1792_s13  }
  0x61   : > { %p1794_p6 = scmp.ne.s32.totalorder %s1785_s6, 0 }
  0x62   : > { %s242_s23 = sand.u32 (!%p1794_p6), 1, %s1336_s19   ;;  %p1795_p1 = scmp.ne.s32.totalorder (!%p1794_p6), %s1781_s29, 0 }
  0x63   : > { %240 = sbr.rel (%p1794_p6) target bundleno = 951 (0x3b7), region = 36  ;;  %s914_s24 = sshll.u32 (!%p1794_p6), %s242_s23, 5 }
  0x64   : > { %s243_s1 = scalar_lea.sflag (!%p1794_p6), [#allocation5], %s242_s23  ;;  %s1588_s9 = scalar_lea.vmem (!%p1794_p6), [#allocation4], %s914_s24 }
  0x68   : > { %1307 = dma.done.wait (%p1795_p1), %s243_s1, 512  }
  0x69   : > { %1309 = vsyncadd (%p1795_p1), %s243_s1, 4294966784  ;;  %p1796_p4 = scmp.ne.s32.totalorder %s1780_s28, 0 }
  0x6b   : > { %1311 = dma.done.wait (%p1796_p4), [#allocation8], 1536  }
  0x6c   : > { %1313 = vsyncadd (%p1796_p4), [#allocation8], 4294965760  ;;  %s276_s4 = sand.u32 1, %s1324_s16   ;;  %p918_p10 = scmp.ne.s32.totalorder %s1344_s21, 0 }
  0x6d   : > { %s917_s6 = sshll.u32 %s276_s4, 5 }
  0x6e   : > { %s1601_s26 = scalar_lea.vmem [#allocation10], %s917_s6  ;;  %292 = sbr.rel (%p918_p10) target bundleno = 117 (0x75), region = 52 }
  0x73   : > { %vm293_vm0 = vcmask 261120   ;;  %v1367_v0 = vmov 0.0  }
  0x74   : > { %294 = vst.msk [vmem:[#allocation2] sm:$0xff] %vm293_vm0, %v1367_v0 }
  0x75 PF: > { %s919_s29 = sshll.u32 %s1348_s22, 4  ;;  %v301_v1 = vld [vmem:[%s1588_s9] sm:$0xff]  ;;  %vm305_vm1 = vcmask 130048   ;;  %v1368_v2 = vmov 0.0   ;;  %s925_s28 = sshll.u32 %s1348_s22, 5  ;;  %vm1369_vm2 = vmmov 0  }
  0x76   : > { %976 = vmatprep.mubr.msk.f32.mxu0 %vm305_vm1, %v301_v1  ;;  %982 = vmatprep.subr.mxu1 %v1368_v2  ;;  %s296_s5 = scalar_lea.vmem [#allocation7], %s919_s29  ;;  %s419_s14 = scalar_lea.vmem [#allocation9], %s925_s28  ;;  %v302_v7 = vld [vmem:[%s1588_s9 + $0x8] sm:$0xff]  ;;  %v303_v8 = vld [vmem:[%s1588_s9 + $0x10] sm:$0xff]  ;;  %v304_v11 = vld [vmem:[%s1588_s9 + $0x18] sm:$0xff]  ;;  %vm413_vm3 = vcmask 261120  }
  0x77   : > { %v298_v3 = vld [vmem:[%s296_s5 + $0x8] sm:$0xff]  ;;  %v297_v4 = vld [vmem:[%s296_s5] sm:$0xff]  ;;  %990 = vmatprep.mubr.msk.f32.mxu1 %vm1369_vm2, %v1368_v2  ;;  %v1611_v5 = vld [vmem:[%s419_s14 + $0x18] sm:$0xff]  ;;  %s299_s12 = scalar_lea.vmem %s1759_s3, %s1348_s22  ;;  %s926_s27 = smul.u32 24, %s1348_s22 }
  0x78   : > { %972 = vmatprep.subr.mxu0 %v298_v3  ;;  %v1613_v6 = vld [vmem:[%s419_s14 + $0x10] sm:$0xff]  ;;  %983 = vmatpush3.msra.mxu1 %v1611_v5  ;;  %v421_v9 = vld [vmem:[%s419_s14 + $0x8] sm:$0xff]  ;;  %v420_v10 = vld [vmem:[%s419_s14] sm:$0xff]  ;;  %s928_s13 = sshll.u32 %s1348_s22, 3  ;;  %s585_s23 = ssub.s32 2, %s1348_s22 }
  0x79   : > { %973 = vmatpush3.msra.mxu0 %v298_v3  ;;  %984 = vmatprep.subr.mxu1 %v1368_v2  ;;  %v924_v13 = vld [vmem:[%s299_s12] ss:$0 sm:$0xff]  ;;  %s427_s11 = scalar_lea.vmem [#allocation3], %s926_s27  ;;  %s826_s18 = scalar_lea.vmem [#allocation3], %s928_s13 }
  0x7a   : > { %974 = vmatprep.subr.mxu0 %v297_v4  ;;  %985 = vmatpush3.msra.mxu1 %v1613_v6  ;;  %s932_s24 = sshll.u32 %s585_s23, 3  ;;  %s939_s9 = sshll.u32 %s1344_s21, 1 }
  0x7b   : > { %975 = vmatpush3.msra.mxu0 %v297_v4  ;;  %986 = vmatprep.subr.mxu1 %v1368_v2  ;;  %v424_v12 = vld [vmem:[#allocation2] sm:$0xff]  ;;  %s587_s1 = scalar_lea.vmem [#allocation3], %s932_s24  ;;  %s764_s6 = ssub.s32 1, %s939_s9 }
  0x7c   : > { %977 = vmatmul.mubr.msk.f32.vlgmr.msra.gmra.mxu0 %vm305_vm1, %v302_v7  ;;  %987 = vmatpush3.msra.mxu1 %v421_v9  ;;  %s934_s29 = smul.u32 4294967272, %s1348_s22  ;;  %s775_s12 = sshll.u32 %s1601_s26, 4  ;;  %s1684_s12 = int_to_ptr.vmem [resolvable:$true] %s775_s12 }
  0x7d   : > { %979 = vmatprep.mubr.msk.f32.mxu0 %vm305_vm1, %v303_v8  ;;  %988 = vmatprep.subr.mxu1 %v1368_v2  ;;  %s765_s28 = smul.u32 %s1348_s22, %s764_s6  ;;  %s1696_s22 = scalar_lea.sflag [#allocation6], %s276_s4 }
  0x7e   : > { %993 = vmatprep.subr.mxu0 %v1368_v2  ;;  %989 = vmatpush3.msra.mxu1 %v420_v10  ;;  %s832_s14 = scalar_lea.vmem [#allocation3], %s934_s29  ;;  %p1799_p12 = scmp.ne.s32.totalorder %s1782_s30, 0 }
  0x7f   : > { %994 = vmatpush3.msra.mxu0 %v1611_v5  ;;  %991 = vmatmul.mubr.msk.f32.vlgmr.msra.gmra.mxu1 %vm413_vm3, %v424_v12  ;;  %s766_s5 = sadd.s32 %s1344_s21, %s765_s28  ;;  %s1370_s24 = smov [#allocation10]  }
  0x80   : > { %980 = vmatmul.mubr.msk.f32.gmra.mxu0 %vm305_vm1, %v304_v11  ;;  %995 = vmatprep.subr.mxu0 %v1368_v2  ;;  %s940_s10 = sshll.u32 %s766_s5, 2  ;;  %s1240_s9 = sshll.u32 %s1370_s24, 4  ;;  %s1241_s9 = int_to_ptr.vmem [resolvable:$false] %s1240_s9 }
  0x81   : > { %1001 = vmatprep.mubr.msk.f32.mxu0 %vm1369_vm2, %v1368_v2  ;;  %996 = vmatpush3.msra.mxu0 %v1613_v6  ;;  %s772_s2 = sadd.s32 %s940_s10, %s928_s13  ;;  %s1236_s13 = scalar_lea.vmem %s1684_s12, 512 }
  0x82   : > { %1004 = vmatprep.subr.mxu1 %v1368_v2  ;;  %997 = vmatprep.subr.mxu0 %v1368_v2  ;;  %s942_s21 = sshll.u32 %s772_s2, 7  ;;  %p1237_p11 = scmp.ne.s32.totalorder %s1684_s12, %s1236_s13 }
  0x83   : > { %1005 = vmatpush3.msra.mxu1 %v1611_v5  ;;  %998 = vmatpush3.msra.mxu0 %v421_v9  ;;  %s1242_s6 = scalar_lea.vmem %s1241_s9, 1024  ;;  %p1243_p7 = scmp.lt.s32.totalorder %s1684_s12, %s1241_s9 }
  0x84   : > { %1006 = vmatprep.subr.mxu1 %v1368_v2  ;;  %999 = vmatprep.subr.mxu0 %v1368_v2  ;;  %p1238_p2 = pnand %p1237_p11, %p1799_p12  ;;  %p1244_p5 = scmp.lt.s32.totalorder %s1242_s6, %s1236_s13 }
  0x85   : > { %1007 = vmatpush3.msra.mxu1 %v1613_v6  ;;  %1000 = vmatpush3.msra.mxu0 %v420_v10 }
  0x86   : > { %1008 = vmatprep.subr.mxu1 %v1368_v2  ;;  %1012 = vmatprep.mubr.msk.f32.mxu1 %vm1369_vm2, %v1368_v2  ;;  %p1239_p3 = pneg %p1238_p2  ;;  %p1245_p8 = por %p1244_p5, %p1243_p7 }
  0x87   : > { %1009 = vmatpush3.msra.mxu1 %v421_v9  ;;  %1015 = vmatprep.subr.mxu0 %v1368_v2 }
  0x88   : > { %1010 = vmatprep.subr.mxu1 %v1368_v2  ;;  %p1246_p9 = pnand %p1245_p8, %p1239_p3 }
  0x89   : > { %1011 = vmatpush3.msra.mxu1 %v420_v10 }
 0x13c   : > { %v978_v14 = vpop.f32.mrf.mxu0 }
 0x13d   : > { %v410_v15 = vadd.f32 %v978_v14, %v924_v13 }
 0x13e   : > { %v384_v16 = vpop.f32.mrf.mxu0 }
 0x13f   : > { %415 = vst.msk [vmem:[#allocation3 + $0x8] sm:$0xff] %vm413_vm3, %v410_v15  ;;  %v409_v17 = vadd.f32 %v924_v13, %v384_v16  ;;  %v498_v19 = vpop.f32.mrf.mxu1 }
 0x140   : > { %v981_v18 = vpop.f32.mrf.mxu0 }
 0x141   : > { %414 = vst.msk [vmem:[#allocation3] sm:$0xff] %vm413_vm3, %v409_v17  ;;  %v412_v20 = vadd.f32 %v981_v18, %v924_v13  ;;  %v992_v22 = vpop.f32.mrf.mxu1 }
 0x142   : > { %v394_v21 = vpop.f32.mrf.mxu0 }
 0x143   : > { %417 = vst.msk [vmem:[#allocation3 + $0x18] sm:$0xff] %vm413_vm3, %v412_v20  ;;  %v411_v23 = vadd.f32 %v924_v13, %v394_v21 }
 0x145   : > { %416 = vst.msk [vmem:[#allocation3 + $0x10] sm:$0xff] %vm413_vm3, %v411_v23 }
 0x14c   : > { %v428_v24 = vld [vmem:[%s427_s11] sm:$0xff] }
 0x14d   : > { %v502_v25 = vadd.f32 %v498_v19, %v428_v24 }
 0x14f   : > { %v503_v26 = vmax.f32 %v502_v25, 0.0 }
 0x151   : > { %504 = vst.msk [vmem:[%s427_s11] sm:$0xff] %vm413_vm3, %v503_v26  ;;  %1002 = vmatmul.mubr.msk.f32.vlgmr.msra.gmra.mxu0 %vm413_vm3, %v503_v26 }
 0x152   : > { %1016 = vmatpush3.msra.mxu0 %v1611_v5  ;;  %1023 = vmatprep.mubr.msk.f32.mxu0 %vm1369_vm2, %v1368_v2 }
 0x153   : > { %1017 = vmatprep.subr.mxu0 %v1368_v2 }
 0x154   : > { %1018 = vmatpush3.msra.mxu0 %v1613_v6 }
 0x155   : > { %1019 = vmatprep.subr.mxu0 %v1368_v2 }
 0x156   : > { %1020 = vmatpush3.msra.mxu0 %v421_v9 }
 0x157   : > { %1021 = vmatprep.subr.mxu0 %v1368_v2 }
 0x158   : > { %1022 = vmatpush3.msra.mxu0 %v420_v10  ;;  %v929_v27 = vld [vmem:[%s826_s18 + $0x8] sm:$0xff] }
 0x211   : > { %v578_v28 = vpop.f32.mrf.mxu0 }
 0x212   : > { %v582_v29 = vadd.f32 %v929_v27, %v578_v28 }
 0x213   : > { %v1003_v30 = vpop.f32.mrf.mxu0 }
 0x214   : > { %v583_v31 = vmax.f32 %v582_v29, 0.0 }
 0x216   : > { %931 = vst.msk [vmem:[%s826_s18 + $0x8] sm:$0xff] %vm413_vm3, %v583_v31  ;;  %1013 = vmatmul.mubr.msk.f32.vlgmr.msra.gmra.mxu1 %vm413_vm3, %v583_v31  ;;  %s1797_s18 = sld [smem:[#allocation21_spill]] }
 0x21c   : > { %s1682_s23 = scalar_lea.hbm %s1797_s18, %s942_s21 }
 0x21d   : > { %v588_v32 = vld [vmem:[%s587_s1] sm:$0xff] }
 0x2d6   : > { %v658_v33 = vpop.f32.mrf.mxu1 }
 0x2d7   : > { %v662_v34 = vadd.f32 %v658_v33, %v588_v32 }
 0x2d8   : > { %v1014_v35 = vpop.f32.mrf.mxu1 }
 0x2d9   : > { %v663_v36 = vmax.f32 %v662_v34, 0.0 }
 0x2db   : > { %664 = vst.msk [vmem:[%s587_s1] sm:$0xff] %vm413_vm3, %v663_v36  ;;  %1024 = vmatmul.mubr.msk.f32.vlgmr.msra.gmra.mxu0 %vm413_vm3, %v663_v36  ;;  %s1798_s1 = smov %s1797_s18 }
 0x2e2   : > { %v935_v37 = vld [vmem:[%s832_s14 + $0x18] sm:$0xff] }
 0x39b   : > { %v739_v38 = vpop.f32.mrf.mxu0 }
 0x39c   : > { %v743_v39 = vadd.f32 %v935_v37, %v739_v38 }
 0x39d   : > { %v1025_v40 = vpop.f32.mrf.mxu0 }
 0x39e   : > { %v744_v41 = vmax.f32 %v743_v39, 0.0 }
 0x3a0   : > { %937 = vst.msk [vmem:[%s832_s14 + $0x18] sm:$0xff] %vm413_vm3, %v744_v41  ;;  %746 = vst.msk [vmem:[#allocation2] sm:$0xff] %vm413_vm3, %v744_v41 }
 0x3a7   : > { %v747_v42 = vld [vmem:[#allocation3] sm:$0xff]  ;;  %v748_v43 = vld [vmem:[#allocation3 + $0x8] sm:$0xff]  ;;  %v749_v44 = vld [vmem:[#allocation3 + $0x10] sm:$0xff] }
 0x3a8   : > { %v750_v45 = vld [vmem:[#allocation3 + $0x18] sm:$0xff]  ;;  %751 = vst.msk [vmem:[%s1601_s26] sm:$0xff] %vm413_vm3, %v747_v42  ;;  %752 = vst.msk [vmem:[%s1601_s26 + $0x8] sm:$0xff] %vm413_vm3, %v748_v43 }
 0x3a9   : > { %753 = vst.msk [vmem:[%s1601_s26 + $0x10] sm:$0xff] %vm413_vm3, %v749_v44  ;;  %754 = vst.msk [vmem:[%s1601_s26 + $0x18] sm:$0xff] %vm413_vm3, %v750_v45 }
 0x3aa   : > { %1249 = shalt.err (!%p1246_p9)
}
 0x3ab   : > { %s1250_s4 = scalar_lea.hbm %s1682_s23, 512  ;;  %s1254_s28 = scalar_lea.hbm %s1798_s1, 2048 }
 0x3ac   : > { %p1251_p0 = scmp.ne.s32.totalorder %s1682_s23, %s1250_s4  ;;  %p1255_p1 = scmp.lt.s32.totalorder %s1682_s23, %s1798_s1 }
 0x3ad   : > { %p1256_p4 = scmp.lt.s32.totalorder %s1254_s28, %s1250_s4 }
 0x3ae   : > { %p1252_p13 = pnand %p1251_p0, %p1799_p12 }
 0x3af   : > { %p1257_p10 = por %p1256_p4, %p1255_p1 }
 0x3b0   : > { %p1253_p6 = pneg %p1252_p13 }
 0x3b2   : > { %p1258_p11 = pnand %p1257_p10, %p1253_p6 }
 0x3b4   : > { %1261 = shalt.err (!%p1258_p11)
}
 0x3b5   : > { %s1371_s10 = smov 128   ;;  %s1372_s2 = smov 8  }
 0x3b6   : > { %1036 = dma.vmem_to_hbm [thread:$0]  (%p1799_p12), %s1684_s12, 512, %s1682_s23, %s1696_s22, %s1371_s10, %s1371_s10, %s1372_s2  }
 0x3b7 PF: > { %s1800_s21 = sld [smem:[#allocation14_spill]]  ;;  %p1058_p2 = scmp.ge.s32.totalorder %s1360_s25, 2 }
 0x3b8   : > { %s1801_s27 = sld [smem:[#allocation17_spill]] }
 0x3bd   : > { %s790_s11 = sand.u32 1, %s1800_s21  }
 0x3be   : > { %p1802_p3 = scmp.ne.s32.totalorder %s1801_s27, 0  ;;  %s791_s18 = scalar_lea.sflag [#allocation6], %s790_s11 }
 0x3c0   : > { %p1050_p7 = pnand %p1058_p2, %p1802_p3 }
 0x3c2   : > { %p1051_p5 = pneg %p1050_p7 }
 0x3c4   : > { %1315 = dma.done.wait (%p1051_p5), %s791_s18, 512  }
 0x3c5   : > { %1317 = vsyncadd (%p1051_p5), %s791_s18, 4294966784  ;;  %s21_s25 = sadd.s32 1, %s1360_s25   ;;  %s1803_s30 = smov %s1541_s15 }
 0x3c6   : > { %p18_p8 = scmp.ge.s32.totalorder %s21_s25, 6   ;;  %s1804_s21 = sld [smem:[#allocation15_spill]] }
 0x3c7   : > { %s1805_s22 = sld [smem:[#allocation16_spill]]  ;;  %s1807_s15 = smov %s1324_s16 }
 0x3c8   : > { %s1806_s24 = sld [smem:[#allocation18_spill]]  ;;  %s1808_s16 = smov %s1328_s17 }
 0x3c9   : > { %s1809_s17 = smov %s1544_s7  ;;  %s1810_s18 = smov %s1336_s19 }
 0x3ca   : > { %s1811_s19 = smov %s1340_s20  ;;  %s1812_s20 = smov %s1803_s30 }
 0x3cb   : > { %s1813_s23 = smov %s1815_s8  ;;  %20 = sbr.rel (!%p18_p8) target bundleno = 14 (0xe), region = 100 }
 0x3d0   :  { %796 = vsyncpa [#allocation5], 1 }
 0x3d1   :  { %798 = vsyncpa [#allocation5 + $0x1], 1 }
 0x3d2   :  { %799 = vsyncpa [#allocation8], 1 }
 0x3d3   :  { %800 = vsyncpa [#allocation6], 1 }
 0x3d4   :  { %802 = vsyncpa [#allocation6 + $0x1], 1 }

</bundles_post_ra>
